<compile_context>
chip_gen: v7x
topology: tpu7x:2x2x1
jax: 0.10.0
libtpu: 0.0.40
codegen_flags: <defaults>
</compile_context>

<pallas_src>
import jax
import jax.numpy as jnp
from jax.experimental import pallas as pl
from jax.experimental.pallas import tpu as pltpu


def _round_up(n: int, m: int) -> int:
    return ((n + m - 1) // m) * m


def _fused_kernel(w1_ref, b1_ref, w2_ref, b2_ref, alpha_ref, x_ref, o_ref):
    """One lane-dense batch tile.

    x_ref : (2, TILE_B) f32 in VMEM  (features on sublanes, batch on lanes)
    w*_ref: (2, 2) f32 in SMEM       (stored as (in, out))
    b*_ref: (2,)   f32 in SMEM
    alpha : (1,)   f32 in SMEM
    o_ref : (2, TILE_B) f32 in VMEM
    """
    x = x_ref[...]                       # (2, T)
    x0 = x[0:1, :]                       # (1, T)
    x1 = x[1:2, :]

    # First folded affine (a -> b.a -> b.l1 -> c) followed by ReLU.
    # Pure VPU broadcast multiply-adds; no MXU involved.
    h0 = x0 * w1_ref[0, 0] + x1 * w1_ref[1, 0] + b1_ref[0]
    h1 = x0 * w1_ref[0, 1] + x1 * w1_ref[1, 1] + b1_ref[1]
    h0 = jnp.maximum(h0, 0.0)
    h1 = jnp.maximum(h1, 0.0)

    # Second folded affine (d.b.a -> d.b.l1), sigmoid, and alpha scale.
    g0 = h0 * w2_ref[0, 0] + h1 * w2_ref[1, 0] + b2_ref[0]
    g1 = h0 * w2_ref[0, 1] + h1 * w2_ref[1, 1] + b2_ref[1]
    alpha = alpha_ref[0]
    y0 = alpha * jax.nn.sigmoid(g0)
    y1 = alpha * jax.nn.sigmoid(g1)

    o_ref[...] = jnp.concatenate([y0, y1], axis=0).astype(o_ref.dtype)


def main_forward(x, params, tile_b: int = 32768):
    """x: (B, 2) float32.  params: dict of per-layer weights/biases/alpha.

    Weights are stored pre-transposed as (in, out) so y = x @ W + b.
    """
    B, F = x.shape
    assert F == 2

    # ---- Fold consecutive Linear layers at trace time (2x2 constants). ----
    # Pre-ReLU chain: a.l1 -> b.a.l1 -> b.l1 -> c.l1
    w1 = params["wa"] @ params["wba"] @ params["wbl"] @ params["wc"]
    b1 = (
        ((params["ba"] @ params["wba"] + params["bba"]) @ params["wbl"] + params["bbl"])
        @ params["wc"]
        + params["bc"]
    )
    # Post-ReLU chain: d.b.a.l1 -> d.b.l1
    w2 = params["wdba"] @ params["wdbl"]
    b2 = params["bdba"] @ params["wdbl"] + params["bdbl"]
    alpha = jnp.asarray(params["alpha"], dtype=jnp.float32).reshape(1)

    # ---- Lane-dense layout: batch on the last (lane) axis. ----
    tile = min(tile_b, _round_up(B, 128))
    b_pad = _round_up(B, tile)
    xt = jnp.zeros((2, b_pad), jnp.float32).at[:, :B].set(x.T)

    smem_spec = lambda: pl.BlockSpec(memory_space=pltpu.MemorySpace.SMEM)

    out = pl.pallas_call(
        _fused_kernel,
        out_shape=jax.ShapeDtypeStruct((2, b_pad), jnp.float32),
        grid=(b_pad // tile,),
        in_specs=[
            smem_spec(),  # w1
            smem_spec(),  # b1
            smem_spec(),  # w2
            smem_spec(),  # b2
            smem_spec(),  # alpha
            pl.BlockSpec((2, tile), lambda i: (0, i)),   # x (lane-dense tile)
        ],
        out_specs=pl.BlockSpec((2, tile), lambda i: (0, i)),
        compiler_params=pltpu.CompilerParams(
            dimension_semantics=("parallel",),
        ),
    )(w1, b1, w2, b2, alpha, xt)

    # Strip padding, return PyTorch-style (B, 2).
    return out[:, :B].T


def init_params(key):
    """Deterministic init matching the PyTorch module's parameter shapes.

    Each nn.Linear(2, 2) has weight (2, 2) and bias (2,).
    Weights are stored transposed (in, out) for x @ W.
    """
    names = ["a", "ba", "bl", "c", "dba", "dbl"]
    keys = jax.random.split(key, 2 * len(names))
    bound = 1.0 / jnp.sqrt(2.0)  # torch default uniform bound for in_features=2
    params = {}
    for i, n in enumerate(names):
        params[f"w{n}"] = jax.random.uniform(
            keys[2 * i], (2, 2), jnp.float32, -bound, bound
        )
        params[f"b{n}"] = jax.random.uniform(
            keys[2 * i + 1], (2,), jnp.float32, -bound, bound
        )
    params["alpha"] = jnp.array(0.941736, dtype=jnp.float32)
    return params


def reference_forward(x, p):
    """Pure-JAX unrolled reference (mirrors the PyTorch graph layer by layer)."""

    def lin(h, w, b):
        return h @ w + b

    h = lin(x, p["wa"], p["ba"])
    h = lin(h, p["wba"], p["bba"])
    h = lin(h, p["wbl"], p["bbl"])
    h = jnp.maximum(lin(h, p["wc"], p["bc"]), 0.0)
    h = lin(h, p["wdba"], p["bdba"])
    h = lin(h, p["wdbl"], p["bdbl"])
    return p["alpha"] * jax.nn.sigmoid(h)


if __name__ == "__main__":
    key = jax.random.PRNGKey(0)
    k_x, k_p = jax.random.split(key)

    batch = 8  # NOTE: at tiny batch the launch overhead dominates; the kernel
    #            is structured to pay off for large B (lane-dense, gridded).
    x = jax.random.normal(k_x, (batch, 2), dtype=jnp.float32)
    params = init_params(k_p)

    out = jax.block_until_ready(main_forward(x, params))
    ref = reference_forward(x, params)

    assert out.shape == (batch, 2)
    assert jnp.allclose(out, ref, atol=1e-5, rtol=1e-5), (out, ref)

    print("KERNEL_OK")
</pallas_src>

<mosaic_0001>
module attributes {stable_mosaic.version = 11 : i64} {
  func.func @_fused_kernel(%arg0: i32, %arg1: memref<2x2xf32, #tpu.memory_space<smem>>, %arg2: memref<2xf32, #tpu.memory_space<smem>>, %arg3: memref<2x2xf32, #tpu.memory_space<smem>>, %arg4: memref<2xf32, #tpu.memory_space<smem>>, %arg5: memref<1xf32, #tpu.memory_space<smem>>, %arg6: memref<2x128xf32, #tpu.memory_space<vmem>>, %arg7: memref<2x128xf32, #tpu.memory_space<vmem>>) attributes {dimension_semantics = [#tpu.dimension_semantics<parallel>], iteration_bounds = array<i64: 1>, scalar_prefetch = 0 : i64, scratch_operands = 0 : i64, tpu.core_type = #tpu.core_type<tc>, window_params = [{transform_indices = @transform_0, window_bounds = array<i64: 2, 2>}, {transform_indices = @transform_1, window_bounds = array<i64: 2>}, {transform_indices = @transform_2, window_bounds = array<i64: 2, 2>}, {transform_indices = @transform_3, window_bounds = array<i64: 2>}, {transform_indices = @transform_4, window_bounds = array<i64: 1>}, {transform_indices = @transform_5, window_bounds = array<i64: 2, 128>}, {transform_indices = @transform_6, window_bounds = array<i64: 2, 128>}]} {
    %c0 = arith.constant 0 : index
    %c0_0 = arith.constant 0 : index
    %0 = vector.load %arg6[%c0, %c0_0] : memref<2x128xf32, #tpu.memory_space<vmem>>, vector<2x128xf32>
    %1 = vector.extract_strided_slice %0 {offsets = [0, 0], sizes = [1, 128], strides = [1, 1]} : vector<2x128xf32> to vector<1x128xf32>
    %2 = vector.extract_strided_slice %0 {offsets = [1, 0], sizes = [1, 128], strides = [1, 1]} : vector<2x128xf32> to vector<1x128xf32>
    %c0_1 = arith.constant 0 : index
    %c0_2 = arith.constant 0 : index
    %3 = memref.load %arg1[%c0_1, %c0_2] : memref<2x2xf32, #tpu.memory_space<smem>>
    %4 = vector.broadcast %3 : f32 to vector<1x128xf32>
    %5 = arith.mulf %1, %4 : vector<1x128xf32>
    %c1 = arith.constant 1 : index
    %c0_3 = arith.constant 0 : index
    %6 = memref.load %arg1[%c1, %c0_3] : memref<2x2xf32, #tpu.memory_space<smem>>
    %7 = vector.broadcast %6 : f32 to vector<1x128xf32>
    %8 = arith.mulf %2, %7 : vector<1x128xf32>
    %9 = arith.addf %5, %8 : vector<1x128xf32>
    %c0_4 = arith.constant 0 : index
    %10 = memref.load %arg2[%c0_4] : memref<2xf32, #tpu.memory_space<smem>>
    %11 = vector.broadcast %10 : f32 to vector<1x128xf32>
    %12 = arith.addf %9, %11 : vector<1x128xf32>
    %c0_5 = arith.constant 0 : index
    %c1_6 = arith.constant 1 : index
    %13 = memref.load %arg1[%c0_5, %c1_6] : memref<2x2xf32, #tpu.memory_space<smem>>
    %14 = vector.broadcast %13 : f32 to vector<1x128xf32>
    %15 = arith.mulf %1, %14 : vector<1x128xf32>
    %c1_7 = arith.constant 1 : index
    %c1_8 = arith.constant 1 : index
    %16 = memref.load %arg1[%c1_7, %c1_8] : memref<2x2xf32, #tpu.memory_space<smem>>
    %17 = vector.broadcast %16 : f32 to vector<1x128xf32>
    %18 = arith.mulf %2, %17 : vector<1x128xf32>
    %19 = arith.addf %15, %18 : vector<1x128xf32>
    %c1_9 = arith.constant 1 : index
    %20 = memref.load %arg2[%c1_9] : memref<2xf32, #tpu.memory_space<smem>>
    %21 = vector.broadcast %20 : f32 to vector<1x128xf32>
    %22 = arith.addf %19, %21 : vector<1x128xf32>
    %cst = arith.constant 0.000000e+00 : f32
    %23 = vector.broadcast %cst : f32 to vector<1x128xf32>
    %24 = arith.maximumf %12, %23 : vector<1x128xf32>
    %cst_10 = arith.constant 0.000000e+00 : f32
    %25 = vector.broadcast %cst_10 : f32 to vector<1x128xf32>
    %26 = arith.maximumf %22, %25 : vector<1x128xf32>
    %c0_11 = arith.constant 0 : index
    %c0_12 = arith.constant 0 : index
    %27 = memref.load %arg3[%c0_11, %c0_12] : memref<2x2xf32, #tpu.memory_space<smem>>
    %28 = vector.broadcast %27 : f32 to vector<1x128xf32>
    %29 = arith.mulf %24, %28 : vector<1x128xf32>
    %c1_13 = arith.constant 1 : index
    %c0_14 = arith.constant 0 : index
    %30 = memref.load %arg3[%c1_13, %c0_14] : memref<2x2xf32, #tpu.memory_space<smem>>
    %31 = vector.broadcast %30 : f32 to vector<1x128xf32>
    %32 = arith.mulf %26, %31 : vector<1x128xf32>
    %33 = arith.addf %29, %32 : vector<1x128xf32>
    %c0_15 = arith.constant 0 : index
    %34 = memref.load %arg4[%c0_15] : memref<2xf32, #tpu.memory_space<smem>>
    %35 = vector.broadcast %34 : f32 to vector<1x128xf32>
    %36 = arith.addf %33, %35 : vector<1x128xf32>
    %c0_16 = arith.constant 0 : index
    %c1_17 = arith.constant 1 : index
    %37 = memref.load %arg3[%c0_16, %c1_17] : memref<2x2xf32, #tpu.memory_space<smem>>
    %38 = vector.broadcast %37 : f32 to vector<1x128xf32>
    %39 = arith.mulf %24, %38 : vector<1x128xf32>
    %c1_18 = arith.constant 1 : index
    %c1_19 = arith.constant 1 : index
    %40 = memref.load %arg3[%c1_18, %c1_19] : memref<2x2xf32, #tpu.memory_space<smem>>
    %41 = vector.broadcast %40 : f32 to vector<1x128xf32>
    %42 = arith.mulf %26, %41 : vector<1x128xf32>
    %43 = arith.addf %39, %42 : vector<1x128xf32>
    %c1_20 = arith.constant 1 : index
    %44 = memref.load %arg4[%c1_20] : memref<2xf32, #tpu.memory_space<smem>>
    %45 = vector.broadcast %44 : f32 to vector<1x128xf32>
    %46 = arith.addf %43, %45 : vector<1x128xf32>
    %c0_21 = arith.constant 0 : index
    %47 = memref.load %arg5[%c0_21] : memref<1xf32, #tpu.memory_space<smem>>
    %48 = arith.negf %36 : vector<1x128xf32>
    %49 = math.exp %48 : vector<1x128xf32>
    %cst_22 = arith.constant 1.000000e+00 : f32
    %50 = vector.broadcast %cst_22 : f32 to vector<1x128xf32>
    %51 = arith.addf %50, %49 : vector<1x128xf32>
    %52 = arith.divf %50, %51 : vector<1x128xf32>
    %53 = vector.broadcast %47 : f32 to vector<1x128xf32>
    %54 = arith.mulf %53, %52 : vector<1x128xf32>
    %55 = arith.negf %46 : vector<1x128xf32>
    %56 = math.exp %55 : vector<1x128xf32>
    %cst_23 = arith.constant 1.000000e+00 : f32
    %57 = vector.broadcast %cst_23 : f32 to vector<1x128xf32>
    %58 = arith.addf %57, %56 : vector<1x128xf32>
    %59 = arith.divf %57, %58 : vector<1x128xf32>
    %60 = vector.broadcast %47 : f32 to vector<1x128xf32>
    %61 = arith.mulf %60, %59 : vector<1x128xf32>
    %62 = tpu.concatenate %54, %61 in 0 : vector<1x128xf32>, vector<1x128xf32> -> vector<2x128xf32>
    %c0_24 = arith.constant 0 : index
    %c0_25 = arith.constant 0 : index
    %63 = vector.load %arg7[%c0_24, %c0_25] : memref<2x128xf32, #tpu.memory_space<vmem>>, vector<2x128xf32>
    tpu.vector_store %arg7[%c0_24, %c0_25], %62 {strides = array<i32>} : memref<2x128xf32, #tpu.memory_space<vmem>>, vector<2x128xf32>,
    return
  }
  func.func @transform_0(%arg0: i32) -> (i32, i32) {
    %c0_i32 = arith.constant 0 : i32
    %c0_i32_0 = arith.constant 0 : i32
    %c0_i32_1 = arith.constant 0 : i32
    return %c0_i32, %c0_i32_0 : i32, i32
  }
  func.func @transform_1(%arg0: i32) -> i32 {
    %c0_i32 = arith.constant 0 : i32
    %c0_i32_0 = arith.constant 0 : i32
    return %c0_i32 : i32
  }
  func.func @transform_2(%arg0: i32) -> (i32, i32) {
    %c0_i32 = arith.constant 0 : i32
    %c0_i32_0 = arith.constant 0 : i32
    %c0_i32_1 = arith.constant 0 : i32
    return %c0_i32, %c0_i32_0 : i32, i32
  }
  func.func @transform_3(%arg0: i32) -> i32 {
    %c0_i32 = arith.constant 0 : i32
    %c0_i32_0 = arith.constant 0 : i32
    return %c0_i32 : i32
  }
  func.func @transform_4(%arg0: i32) -> i32 {
    %c0_i32 = arith.constant 0 : i32
    %c0_i32_0 = arith.constant 0 : i32
    return %c0_i32 : i32
  }
  func.func @transform_5(%arg0: i32) -> (i32, i32) {
    %c0_i32 = arith.constant 0 : i32
    %c0_i32_0 = arith.constant 0 : i32
    return %c0_i32, %arg0 : i32, i32
  }
  func.func @transform_6(%arg0: i32) -> (i32, i32) {
    %c0_i32 = arith.constant 0 : i32
    %c0_i32_0 = arith.constant 0 : i32
    return %c0_i32, %arg0 : i32, i32
  }
}

</mosaic_0001>

<bundles_post_ra>
// kernel: tpu_custom_call.1
= control target key start
LH: loop header
LB: loop body
LE: loop exit
PB: predicated region body
PF: predicated region fallthrough
CT: control target
= control target key end

     0   :  { %12 = vsyncpa [#allocation5], 0  ;;  %s332_s0 = inlined_call_operand.vmem [shape: f32[2,2], index: 0, kind: input, shape index: {}]   ;;  %s333_s1 = inlined_call_operand.vmem [shape: f32[2], index: 1, kind: input, shape index: {}]   ;;  %s334_s2 = inlined_call_operand.vmem [shape: f32[2,2], index: 2, kind: input, shape index: {}]   ;;  %s335_s3 = inlined_call_operand.vmem [shape: f32[2], index: 3, kind: input, shape index: {}]   ;;  %s336_s4 = inlined_call_operand.<no memory space> [shape: f32[1], index: 4, kind: input, shape index: {}]   ;;  %s337_s5 = inlined_call_operand.vmem [shape: f32[2,128], index: 5, kind: input, shape index: {}]   ;;  %s338_s6 = inlined_call_operand.hbm [shape: f32[2,128], index: 6, kind: output, shape index: {}]  }
   0x1   :  { %13 = vsyncpa [#allocation7], 0 }
   0x2   :  { %14 = vsyncpa [#allocation10], 0  ;;  %s32_s23 = sshll.u32 %s333_s1, 4  ;;  %s33_s23 = int_to_ptr.vmem [resolvable:$true] %s32_s23 }
   0x3   :  { %15 = vsyncpa [#allocation4], 0  ;;  %s22_s26 = sshll.u32 %s332_s0, 4  ;;  %s184_s27 = scalar_lea.vmem %s33_s23, 16  ;;  %s23_s26 = int_to_ptr.vmem [resolvable:$true] %s22_s26 }
   0x4   :  { %p185_p0 = scmp.ne.s32.totalorder %s33_s23, %s184_s27  ;;  %p189_p1 = scmp.lt.s32.totalorder %s33_s23, %s33_s23 }
   0x5   :  { %p190_p2 = scmp.lt.s32.totalorder %s184_s27, %s184_s27 }
   0x7   :  { %p191_p3 = por %p190_p2, %p189_p1 }
   0x9   :  { %p192_p4 = pnand %p191_p3, %p185_p0 }
   0xb   :  { %195 = shalt.err (!%p192_p4)
}
   0xc   :  { %s262_s28 = smov [#allocation6]   ;;  %s196_s29 = scalar_lea.vmem %s23_s26, 32 }
   0xd   :  { %35 = dma.vmem_to_smem %s33_s23, 16, %s262_s28, [#allocation7]  }
   0xe   :  { %p197_p5 = scmp.ne.s32.totalorder %s23_s26, %s196_s29  ;;  %p201_p6 = scmp.lt.s32.totalorder %s23_s26, %s23_s26 }
   0xf   :  { %p202_p7 = scmp.lt.s32.totalorder %s196_s29, %s196_s29 }
  0x11   :  { %p203_p8 = por %p202_p7, %p201_p6 }
  0x13   :  { %p204_p9 = pnand %p203_p8, %p197_p5 }
  0x15   :  { %207 = shalt.err (!%p204_p9)
}
  0x16   :  { %s263_s1 = smov [#allocation3]   ;;  %s42_s7 = sshll.u32 %s334_s2, 4  ;;  %s43_s7 = int_to_ptr.vmem [resolvable:$true] %s42_s7 }
  0x17   :  { %25 = dma.vmem_to_smem %s23_s26, 32, %s263_s1, [#allocation5]  }
  0x18   :  { %s52_s10 = sshll.u32 %s335_s3, 4  ;;  %s208_s11 = scalar_lea.vmem %s43_s7, 32  ;;  %s53_s10 = int_to_ptr.vmem [resolvable:$true] %s52_s10 }
  0x19   :  { %p209_p10 = scmp.ne.s32.totalorder %s43_s7, %s208_s11  ;;  %p213_p11 = scmp.lt.s32.totalorder %s43_s7, %s43_s7 }
  0x1a   :  { %p214_p12 = scmp.lt.s32.totalorder %s208_s11, %s208_s11 }
  0x1c   :  { %p215_p13 = por %p214_p12, %p213_p11 }
  0x1e   :  { %p216_p0 = pnand %p215_p13, %p209_p10 }
  0x20   :  { %219 = shalt.err (!%p216_p0)
}
  0x21   :  { %s264_s12 = smov [#allocation8]   ;;  %s220_s13 = scalar_lea.vmem %s53_s10, 16 }
  0x22   :  { %45 = dma.vmem_to_smem %s43_s7, 32, %s264_s12, [#allocation7]  }
  0x23   :  { %p221_p1 = scmp.ne.s32.totalorder %s53_s10, %s220_s13  ;;  %p225_p2 = scmp.lt.s32.totalorder %s53_s10, %s53_s10 }
  0x24   :  { %p226_p3 = scmp.lt.s32.totalorder %s220_s13, %s220_s13 }
  0x26   :  { %p227_p4 = por %p226_p3, %p225_p2 }
  0x28   :  { %p228_p5 = pnand %p227_p4, %p221_p1 }
  0x2a   :  { %231 = shalt.err (!%p228_p5)
}
  0x2b   :  { %s265_s2 = smov [#allocation9]  }
  0x2c   :  { %55 = dma.vmem_to_smem %s53_s10, 16, %s265_s2, [#allocation10]  }
  0x2d   :  { %254 = dma.done.wait [#allocation5], 32  }
  0x2e   :  { %255 = vsyncadd [#allocation5], 4294967264 }
  0x2f   :  { %256 = dma.done.wait [#allocation7], 48  }
  0x30   :  { %257 = vsyncadd [#allocation7], 4294967248 }
  0x31   :  { %258 = dma.done.wait [#allocation10], 16  }
  0x32   :  { %259 = vsyncadd [#allocation10], 4294967280 }
  0x33   :  { %72 = sfence }
  0x34   :  { %s74_s3 = sld [smem:[#allocation3]]  ;;  %s162_s15 = sld [smem:[#allocation3 + $0x1]]  ;;  %v73_v0 = vld [vmem:[%s337_s5] sm:$0x3]  ;;  %v129_v39 = vstv %s336_s4  ;;  %vm141_vm0 = vcmask 1040384  }
  0x35   :  { %s161_s14 = sld [smem:[#allocation3 + $0x80]]  ;;  %s163_s17 = sld [smem:[#allocation3 + $0x81]] }
  0x36   :  { %s84_s16 = sld [smem:[#allocation6]]  ;;  %s164_s20 = sld [smem:[#allocation6 + $0x1]] }
  0x37   :  { %s102_s21 = sld [smem:[#allocation8]]  ;;  %s166_s22 = sld [smem:[#allocation8 + $0x1]] }
  0x38   :  { %s165_s23 = sld [smem:[#allocation8 + $0x80]]  ;;  %s167_s24 = sld [smem:[#allocation8 + $0x81]] }
  0x39   :  { %s109_s25 = sld [smem:[#allocation9]]  ;;  %s168_s5 = sld [smem:[#allocation9 + $0x1]] }
  0x3a   :  { %v75_v1 = vstv %s74_s3  ;;  %v88_v5 = vstv %s162_s15  ;;  %s266_s28 = smov [#allocation11]  }
  0x3b   :  { %v78_v2 = vstv %s161_s14  ;;  %v76_v3 = vmul.f32 %v75_v1, %v73_v0  ;;  %v91_v6 = vstv %s163_s17  ;;  %v89_v8 = vmul.f32 %v88_v5, %v73_v0  ;;  %s150_s29 = sshll.u32 %s266_s28, 4  ;;  %s151_s29 = int_to_ptr.vmem [resolvable:$true] %s150_s29 }
  0x3c   :  { %v79_v4 = vmul.f32 %v78_v2, %v73_v0  ;;  %v92_v9 = vmul.f32 %v91_v6, %v73_v0  ;;  %v85_v10 = vstv %s84_s16  ;;  %v98_v13 = vstv %s164_s20  ;;  %s232_s1 = scalar_lea.vmem %s151_s29, 32  ;;  %p237_p7 = scmp.lt.s32.totalorder %s151_s29, %s151_s29 }
  0x3d   :  { %v103_v16 = vstv %s102_s21  ;;  %v113_v17 = vstv %s166_s22  ;;  %p233_p6 = scmp.ne.s32.totalorder %s151_s29, %s232_s1  ;;  %p238_p8 = scmp.lt.s32.totalorder %s232_s1, %s232_s1 }
  0x3e   :  { %v81_v7 = vrot.slane %v79_v4, 1  ;;  %v94_v12 = vrot.slane %v92_v9, 1  ;;  %v106_v20 = vstv %s165_s23  ;;  %v116_v21 = vstv %s167_s24 }
  0x3f   :  { %v110_v27 = vstv %s109_s25  ;;  %v120_v28 = vstv %s168_s5  ;;  %p239_p9 = por %p238_p8, %p237_p7 }
  0x40   :  { %v83_v11 = vadd.f32 %v81_v7, %v76_v3  ;;  %v96_v15 = vadd.f32 %v94_v12, %v89_v8 }
  0x41   :  { %p240_p10 = pnand %p239_p9, %p233_p6 }
  0x42   :  { %v86_v14 = vadd.f32 %v85_v10, %v83_v11  ;;  %v99_v18 = vadd.f32 %v98_v13, %v96_v15 }
  0x44   :  { %v100_v19 = vmax.f32 %v86_v14, 0.0  ;;  %v101_v22 = vmax.f32 %v99_v18, 0.0 }
  0x46   :  { %v104_v23 = vmul.f32 %v103_v16, %v100_v19  ;;  %v114_v24 = vmul.f32 %v113_v17, %v100_v19  ;;  %v107_v25 = vmul.f32 %v106_v20, %v101_v22  ;;  %v117_v26 = vmul.f32 %v116_v21, %v101_v22 }
  0x48   :  { %v108_v29 = vadd.f32 %v107_v25, %v104_v23  ;;  %v118_v30 = vadd.f32 %v117_v26, %v114_v24 }
  0x4a   :  { %v111_v31 = vadd.f32 %v110_v27, %v108_v29  ;;  %v121_v32 = vadd.f32 %v120_v28, %v118_v30 }
  0x4c   :  { %v169_v33 = vmul.f32 -1.442695, %v111_v31  ;;  %v170_v34 = vmul.f32 -1.442695, %v121_v32 }
  0x4e   :  { %176 = vpow2.f32 %v169_v33 }
  0x4f   :  { %178 = vpow2.f32 %v170_v34 }
  0x58   :  { %v177_v35 = vpop.eup %176 }
  0x59   :  { %v179_v36 = vpop.eup %178  ;;  %v126_v37 = vadd.f32 1.0, %v177_v35 }
  0x5a   :  { %v134_v38 = vadd.f32 1.0, %v179_v36 }
  0x5b   :  { %180 = vrcp.f32 %v126_v37 }
  0x5c   :  { %182 = vrcp.f32 %v134_v38 }
  0x65   :  { %v181_v40 = vpop.eup %180 }
  0x66   :  { %v183_v41 = vpop.eup %182  ;;  %v130_v42 = vmul.f32 %v181_v40, %v129_v39 }
  0x67   :  { %v137_v43 = vmul.f32 %v183_v41, %v129_v39 }
  0x69   :  { %v139_v44 = vrot.slane %v137_v43, 7 }
  0x6b   :  { %v142_v45 = vsel %vm141_vm0, %v130_v42, %v139_v44 }
  0x6c   :  { %143 = vst [vmem:[#allocation11] sm:$0x3] %v142_v45 }
  0x6d   :  { %243 = shalt.err (!%p240_p10)
}
  0x6e   :  { %s244_s30 = scalar_lea.hbm %s338_s6, 32 }
  0x6f   :  { %p245_p11 = scmp.ne.s32.totalorder %s338_s6, %s244_s30  ;;  %p248_p12 = scmp.lt.u32.totalorder %s244_s30, %s338_s6 }
  0x71   :  { %p250_p13 = pnand %p248_p12, %p245_p11 }
  0x73   :  { %253 = shalt.err (!%p250_p13)
}
  0x74   :  { %153 = dma.vmem_to_hbm [thread:$0]  %s151_s29, 32, %s338_s6, [#allocation4]  }
  0x75   :  { %260 = dma.done.wait [#allocation4], 32  }
  0x76   :  { %261 = vsyncadd [#allocation4], 4294967264 }
  0x77   :  { %157 = vsyncpa [#allocation4], 1 }
  0x78   :  { %158 = vsyncpa [#allocation5], 1 }
  0x79   :  { %159 = vsyncpa [#allocation7], 1 }
  0x7a   :  { %160 = vsyncpa [#allocation10], 1 }

</bundles_post_ra>
